<compile_context>
chip_gen: v6e
topology: v6e:2x2x1
jax: 0.10.0
libtpu: 0.0.40
codegen_flags: <defaults>
</compile_context>

<pallas_src>
import functools

import jax
import jax.numpy as jnp
from jax.experimental import pallas as pl
from jax.experimental.pallas import tpu as pltpu


def _round_up(x, m):
    return ((x + m - 1) // m) * m


_VMEM_LIMIT = 32 * 1024 * 1024          # safe scoped-VMEM budget on v5e/v6e/v7x
_RESIDENT_S_BYTES = 8 * 1024 * 1024     # keep projected features VMEM-resident below this
_FUSED_SMALL_BYTES = 6 * 1024 * 1024    # whole problem VMEM-resident below this


def _choose_node_tiling(N):
    """Pad the node dim to a multiple of the K tile so the adj stream keeps big
    (roofline-efficient) tiles, and keep >= 2 row tiles so both v7x TensorCores work."""
    np128 = _round_up(N, 128)
    tk = 128
    for cand in (512, 256, 128):
        if 10 * _round_up(N, cand) <= 13 * np128:   # accept <= ~30% padded rows
            tk = cand
            break
    Np = _round_up(N, tk)
    tm = tk
    if Np // tm < 2 and tm >= 256:                  # >= 2 row tiles for megacore
        tm //= 2
    return Np, tm, tk


# ---------------------------------------------------------------------------
# s1 = x @ W1   (row/K-tiled projection; tiny next to the adj streams)
# ---------------------------------------------------------------------------
def _xw_kernel(x_ref, w_ref, o_ref, acc_ref):
    f = pl.program_id(1)

    @pl.when(f == 0)
    def _():
        acc_ref[...] = jnp.zeros_like(acc_ref)

    acc_ref[...] += jnp.dot(x_ref[...], w_ref[...], preferred_element_type=jnp.float32)

    @pl.when(f == pl.num_programs(1) - 1)
    def _():
        o_ref[...] = acc_ref[...].astype(o_ref.dtype)


def _xw(x_p, w_p, tm):
    Np, Fp = x_p.shape
    Hp = w_p.shape[1]
    tf = max(t for t in (512, 256, 128) if Fp % t == 0)
    return pl.pallas_call(
        _xw_kernel,
        out_shape=jax.ShapeDtypeStruct((Np, Hp), jnp.bfloat16),
        grid=(Np // tm, Fp // tf),
        in_specs=[
            pl.BlockSpec((tm, tf), lambda i, f: (i, f)),
            pl.BlockSpec((tf, Hp), lambda i, f: (f, 0)),
        ],
        out_specs=pl.BlockSpec((tm, Hp), lambda i, f: (i, 0)),
        scratch_shapes=[pltpu.VMEM((tm, Hp), jnp.float32)],
        compiler_params=pltpu.CompilerParams(
            dimension_semantics=("parallel", "arbitrary"),
            vmem_limit_bytes=_VMEM_LIMIT,
        ),
    )(x_p, w_p)


# ---------------------------------------------------------------------------
# Layer 1 + fused layer-2 projection:
#   s2 = relu(adj @ s1 + b1) @ W2      (h1 never touches HBM)
# ---------------------------------------------------------------------------
def _agg1_kernel(adj_ref, s1_ref, b1_ref, w2_ref, s2_ref, acc_ref, *, tk, s_resident):
    k = pl.program_id(1)

    @pl.when(k == 0)
    def _():
        acc_ref[...] = jnp.zeros_like(acc_ref)

    if s_resident:
        s_blk = s1_ref[pl.ds(pl.multiple_of(k * tk, tk), tk), :]
    else:
        s_blk = s1_ref[...]
    acc_ref[...] += jnp.dot(adj_ref[...], s_blk, preferred_element_type=jnp.float32)

    @pl.when(k == pl.num_programs(1) - 1)
    def _():
        h1 = jnp.maximum(acc_ref[...] + b1_ref[...], 0.0)           # bias after adj matmul
        # TODO(synk): training-mode dropout would go here (eval => identity).
        # Fused layer-2 projection: rides the idle MXU of this HBM-bound kernel.
        s2_ref[...] = jnp.dot(
            h1.astype(jnp.bfloat16), w2_ref[...], preferred_element_type=jnp.float32
        ).astype(s2_ref.dtype)


def _adj_relu_proj(adj_p, s1, b1_p, w2_p, tm, tk, s_resident):
    Np = adj_p.shape[0]
    Hp = s1.shape[1]
    Cp = w2_p.shape[1]
    kernel = functools.partial(_agg1_kernel, tk=tk, s_resident=s_resident)
    s_spec = (pl.BlockSpec((Np, Hp), lambda i, k: (0, 0)) if s_resident
              else pl.BlockSpec((tk, Hp), lambda i, k: (k, 0)))
    return pl.pallas_call(
        kernel,
        out_shape=jax.ShapeDtypeStruct((Np, Cp), jnp.bfloat16),
        grid=(Np // tm, Np // tk),
        in_specs=[
            pl.BlockSpec((tm, tk), lambda i, k: (i, k)),
            s_spec,
            pl.BlockSpec((1, Hp), lambda i, k: (0, 0)),
            pl.BlockSpec((Hp, Cp), lambda i, k: (0, 0)),
        ],
        out_specs=pl.BlockSpec((tm, Cp), lambda i, k: (i, 0)),
        scratch_shapes=[pltpu.VMEM((tm, Hp), jnp.float32)],
        compiler_params=pltpu.CompilerParams(
            dimension_semantics=("parallel", "arbitrary"),
            vmem_limit_bytes=_VMEM_LIMIT,
        ),
    )(adj_p, s1, b1_p, w2_p)


# ---------------------------------------------------------------------------
# Layer 2 aggregation:  out = log_softmax(adj @ s2 + b2, axis=1)
# ---------------------------------------------------------------------------
def _agg2_kernel(adj_ref, s2_ref, b2_ref, o_ref, acc_ref, *, tk, s_resident, valid_cols):
    k = pl.program_id(1)

    @pl.when(k == 0)
    def _():
        acc_ref[...] = jnp.zeros_like(acc_ref)

    if s_resident:
        s_blk = s2_ref[pl.ds(pl.multiple_of(k * tk, tk), tk), :]
    else:
        s_blk = s2_ref[...]
    acc_ref[...] += jnp.dot(adj_ref[...], s_blk, preferred_element_type=jnp.float32)

    @pl.when(k == pl.num_programs(1) - 1)
    def _():
        z = acc_ref[...] + b2_ref[...]
        col = jax.lax.broadcasted_iota(jnp.int32, z.shape, 1)
        zm = jnp.where(col < valid_cols, z, -jnp.inf)                # mask padded classes
        m = jnp.max(zm, axis=1, keepdims=True)
        lse = jnp.log(jnp.sum(jnp.exp(zm - m), axis=1, keepdims=True))
        o_ref[...] = (z - m - lse).astype(o_ref.dtype)


def _adj_logsoftmax(adj_p, s2, b2_p, tm, tk, s_resident, valid_cols):
    Np = adj_p.shape[0]
    Cp = s2.shape[1]
    kernel = functools.partial(_agg2_kernel, tk=tk, s_resident=s_resident,
                               valid_cols=valid_cols)
    s_spec = (pl.BlockSpec((Np, Cp), lambda i, k: (0, 0)) if s_resident
              else pl.BlockSpec((tk, Cp), lambda i, k: (k, 0)))
    return pl.pallas_call(
        kernel,
        out_shape=jax.ShapeDtypeStruct((Np, Cp), jnp.float32),
        grid=(Np // tm, Np // tk),
        in_specs=[
            pl.BlockSpec((tm, tk), lambda i, k: (i, k)),
            s_spec,
            pl.BlockSpec((1, Cp), lambda i, k: (0, 0)),
        ],
        out_specs=pl.BlockSpec((tm, Cp), lambda i, k: (i, 0)),
        scratch_shapes=[pltpu.VMEM((tm, Cp), jnp.float32)],
        compiler_params=pltpu.CompilerParams(
            dimension_semantics=("parallel", "arbitrary"),
            vmem_limit_bytes=_VMEM_LIMIT,
        ),
    )(adj_p, s2, b2_p)


# ---------------------------------------------------------------------------
# Small-graph path: the whole forward in one kernel, all operands VMEM-resident.
# ---------------------------------------------------------------------------
def _fused_small_kernel(x_ref, adj_ref, w1_ref, b1_ref, w2_ref, b2_ref, o_ref, *,
                        valid_cols):
    bf16 = jnp.bfloat16
    adj = adj_ref[...]
    s1 = jnp.dot(x_ref[...], w1_ref[...], preferred_element_type=jnp.float32)
    h1 = jnp.maximum(
        jnp.dot(adj, s1.astype(bf16), preferred_element_type=jnp.float32) + b1_ref[...],
        0.0)
    # TODO(synk): training-mode dropout would go here (eval => identity).
    s2 = jnp.dot(h1.astype(bf16), w2_ref[...], preferred_element_type=jnp.float32)
    z = jnp.dot(adj, s2.astype(bf16), preferred_element_type=jnp.float32) + b2_ref[...]
    col = jax.lax.broadcasted_iota(jnp.int32, z.shape, 1)
    zm = jnp.where(col < valid_cols, z, -jnp.inf)
    m = jnp.max(zm, axis=1, keepdims=True)
    lse = jnp.log(jnp.sum(jnp.exp(zm - m), axis=1, keepdims=True))
    o_ref[...] = (z - m - lse).astype(o_ref.dtype)


def _fused_small(x_p, adj_p, w1_p, b1_p, w2_p, b2_p, valid_cols):
    Np, Fp = x_p.shape
    Hp = w1_p.shape[1]
    Cp = w2_p.shape[1]
    kernel = functools.partial(_fused_small_kernel, valid_cols=valid_cols)
    return pl.pallas_call(
        kernel,
        out_shape=jax.ShapeDtypeStruct((Np, Cp), jnp.float32),
        grid=(1,),
        in_specs=[
            pl.BlockSpec((Np, Fp), lambda i: (0, 0)),
            pl.BlockSpec((Np, Np), lambda i: (0, 0)),
            pl.BlockSpec((Fp, Hp), lambda i: (0, 0)),
            pl.BlockSpec((1, Hp), lambda i: (0, 0)),
            pl.BlockSpec((Hp, Cp), lambda i: (0, 0)),
            pl.BlockSpec((1, Cp), lambda i: (0, 0)),
        ],
        out_specs=pl.BlockSpec((Np, Cp), lambda i: (0, 0)),
        compiler_params=pltpu.CompilerParams(
            dimension_semantics=("arbitrary",),
            vmem_limit_bytes=_VMEM_LIMIT,
        ),
    )(x_p, adj_p, w1_p, b1_p, w2_p, b2_p)


# ---------------------------------------------------------------------------
# Full forward pass
# ---------------------------------------------------------------------------
def gpn_base_forward(x, adj, w1, b1, w2, b2, *, use_fused_small=None):
    N, F = x.shape
    H = w1.shape[1]
    C = w2.shape[1]
    assert adj.shape == (N, N)
    assert w2.shape[0] == H

    f32, bf16 = jnp.float32, jnp.bfloat16
    Fp = _round_up(F, 128)     # lane-dense feature loads / clean MXU K dim
    Hp = _round_up(H, 128)     # hidden lane dim (do not over-pad beyond 128 multiples)
    Cp = _round_up(C, 128)     # class lane dim

    if use_fused_small is None:
        np128 = _round_up(N, 128)
        est = (np128 * np128 * 2 + np128 * Fp * 2 + Fp * Hp * 2 + Hp * Cp * 2
               + np128 * (Hp + Cp) * 4 + np128 * Cp * 4)
        use_fused_small = est <= _FUSED_SMALL_BYTES

    if use_fused_small:
        Np, tm, tk = _round_up(N, 128), None, None
    else:
        Np, tm, tk = _choose_node_tiling(N)

    # Zero padding is exact for all the matmuls; padded class lanes are masked inside
    # the log_softmax and padded rows/cols are sliced off at the end.
    x_p = jnp.zeros((Np, Fp), bf16).at[:N, :F].set(x.astype(bf16))
    adj_p = jnp.zeros((Np, Np), bf16).at[:N, :N].set(adj.astype(bf16))
    w1_p = jnp.zeros((Fp, Hp), bf16).at[:F, :H].set(w1.astype(bf16))
    b1_p = jnp.zeros((1, Hp), f32).at[:, :H].set(b1.astype(f32).reshape(1, H))
    w2_p = jnp.zeros((Hp, Cp), bf16).at[:H, :C].set(w2.astype(bf16))
    b2_p = jnp.zeros((1, Cp), f32).at[:, :C].set(b2.astype(f32).reshape(1, C))

    if use_fused_small:
        out = _fused_small(x_p, adj_p, w1_p, b1_p, w2_p, b2_p, valid_cols=C)
        return out[:N, :C]

    # Tiled path (large graphs): adj is the only big HBM stream.
    s1_resident = Np * Hp * 2 <= _RESIDENT_S_BYTES
    s2_resident = Np * Cp * 2 <= _RESIDENT_S_BYTES

    s1 = _xw(x_p, w1_p, tm)                                            # (Np, Hp) bf16
    s2 = _adj_relu_proj(adj_p, s1, b1_p, w2_p, tm, tk, s1_resident)    # (Np, Cp) bf16
    out = _adj_logsoftmax(adj_p, s2, b2_p, tm, tk, s2_resident, C)     # (Np, Cp) f32
    return out[:N, :C]


def reference_forward(x, adj, w1, b1, w2, b2):
    h1 = jnp.maximum(adj @ (x @ w1) + b1, 0.0)
    z = adj @ (h1 @ w2) + b2
    return jax.nn.log_softmax(z, axis=1)


if __name__ == "__main__":
    key = jax.random.PRNGKey(0)

    def make_problem(k, N, nfeat, nhid, nclass):
        H = 2 * nhid
        kx, ka, kw1, kb1, kw2, kb2 = jax.random.split(k, 6)
        x = jax.random.normal(kx, (N, nfeat), dtype=jnp.float32)
        # Random sparse-ish symmetric adjacency with self loops, row-normalized.
        a = (jax.random.uniform(ka, (N, N)) < 0.1).astype(jnp.float32)
        a = jnp.maximum(a, a.T) + jnp.eye(N, dtype=jnp.float32)
        adj = a / jnp.sum(a, axis=1, keepdims=True)
        # GraphConvolution-style uniform init: U(-1/sqrt(out), 1/sqrt(out)).
        std1 = 1.0 / (H ** 0.5)
        w1 = jax.random.uniform(kw1, (nfeat, H), minval=-std1, maxval=std1, dtype=jnp.float32)
        b1 = jax.random.uniform(kb1, (1, H), minval=-std1, maxval=std1, dtype=jnp.float32)
        std2 = 1.0 / (nclass ** 0.5)
        w2 = jax.random.uniform(kw2, (H, nclass), minval=-std2, maxval=std2, dtype=jnp.float32)
        b2 = jax.random.uniform(kb2, (1, nclass), minval=-std2, maxval=std2, dtype=jnp.float32)
        return x, adj, w1, b1, w2, b2

    k1, k2 = jax.random.split(key)

    # 1) Small demo shape -> single fully fused, VMEM-resident kernel.
    args1 = make_problem(k1, N=64, nfeat=32, nhid=16, nclass=8)
    out1 = jax.block_until_ready(gpn_base_forward(*args1))
    ref1 = reference_forward(*args1)
    assert out1.shape == (64, 8)
    # bf16 MXU inputs (f32 accumulation) => looser tolerance than a pure-f32 kernel.
    assert jnp.allclose(out1, ref1, atol=3e-2, rtol=3e-2), "fused-small path mismatch"

    # 2) Force the tiled large-graph path (adj streaming, K accumulation, fused
    #    layer-2 projection, VMEM-resident projected features) at a small size.
    args2 = make_problem(k2, N=300, nfeat=96, nhid=24, nclass=7)
    out2 = jax.block_until_ready(gpn_base_forward(*args2, use_fused_small=False))
    ref2 = reference_forward(*args2)
    assert out2.shape == (300, 7)
    assert jnp.allclose(out2, ref2, atol=3e-2, rtol=3e-2), "tiled path mismatch"

    print("KERNEL_OK")
</pallas_src>

<mosaic_0001>
module attributes {stable_mosaic.version = 11 : i64} {
  func.func @_fused_small_kernel(%arg0: i32, %arg1: memref<128x128xbf16, #tpu.memory_space<vmem>>, %arg2: memref<128x128xbf16, #tpu.memory_space<vmem>>, %arg3: memref<128x128xbf16, #tpu.memory_space<vmem>>, %arg4: memref<1x128xf32, #tpu.memory_space<vmem>>, %arg5: memref<128x128xbf16, #tpu.memory_space<vmem>>, %arg6: memref<1x128xf32, #tpu.memory_space<vmem>>, %arg7: memref<128x128xf32, #tpu.memory_space<vmem>>) attributes {dimension_semantics = [#tpu.dimension_semantics<arbitrary>], iteration_bounds = array<i64: 1>, scalar_prefetch = 0 : i64, scratch_operands = 0 : i64, tpu.core_type = #tpu.core_type<tc>, window_params = [{pipeline_mode = #tpu.pipeline_mode<synchronous>, transform_indices = @transform_0, window_bounds = array<i64: 128, 128>}, {pipeline_mode = #tpu.pipeline_mode<synchronous>, transform_indices = @transform_1, window_bounds = array<i64: 128, 128>}, {pipeline_mode = #tpu.pipeline_mode<synchronous>, transform_indices = @transform_2, window_bounds = array<i64: 128, 128>}, {pipeline_mode = #tpu.pipeline_mode<synchronous>, transform_indices = @transform_3, window_bounds = array<i64: 1, 128>}, {pipeline_mode = #tpu.pipeline_mode<synchronous>, transform_indices = @transform_4, window_bounds = array<i64: 128, 128>}, {pipeline_mode = #tpu.pipeline_mode<synchronous>, transform_indices = @transform_5, window_bounds = array<i64: 1, 128>}, {pipeline_mode = #tpu.pipeline_mode<synchronous>, transform_indices = @transform_6, window_bounds = array<i64: 128, 128>}]} {
    %c0 = arith.constant 0 : index
    %c0_0 = arith.constant 0 : index
    %0 = vector.load %arg2[%c0, %c0_0] : memref<128x128xbf16, #tpu.memory_space<vmem>>, vector<128x128xbf16>
    %c0_1 = arith.constant 0 : index
    %c0_2 = arith.constant 0 : index
    %1 = vector.load %arg1[%c0_1, %c0_2] : memref<128x128xbf16, #tpu.memory_space<vmem>>, vector<128x128xbf16>
    %c0_3 = arith.constant 0 : index
    %c0_4 = arith.constant 0 : index
    %2 = vector.load %arg3[%c0_3, %c0_4] : memref<128x128xbf16, #tpu.memory_space<vmem>>, vector<128x128xbf16>
    %cst = arith.constant dense<0.000000e+00> : vector<128x128xf32>
    %3 = tpu.matmul %1, %2, %cst {dimension_numbers = #tpu.dot_dimension_numbers<[1], [0], [0], [1], [0, 0, 1, 1], [], []>} : vector<128x128xbf16>, vector<128x128xbf16>, vector<128x128xf32> -> vector<128x128xf32>
    %4 = arith.truncf %3 : vector<128x128xf32> to vector<128x128xbf16>
    %cst_5 = arith.constant dense<0.000000e+00> : vector<128x128xf32>
    %5 = tpu.matmul %0, %4, %cst_5 {dimension_numbers = #tpu.dot_dimension_numbers<[1], [0], [0], [1], [0, 0, 1, 1], [], []>} : vector<128x128xbf16>, vector<128x128xbf16>, vector<128x128xf32> -> vector<128x128xf32>
    %c0_6 = arith.constant 0 : index
    %c0_7 = arith.constant 0 : index
    %6 = vector.load %arg4[%c0_6, %c0_7] : memref<1x128xf32, #tpu.memory_space<vmem>>, vector<1x128xf32>
    %7 = vector.broadcast %6 : vector<1x128xf32> to vector<128x128xf32>
    %8 = arith.addf %5, %7 : vector<128x128xf32>
    %cst_8 = arith.constant 0.000000e+00 : f32
    %9 = vector.broadcast %cst_8 : f32 to vector<128x128xf32>
    %10 = arith.maximumf %8, %9 : vector<128x128xf32>
    %11 = arith.truncf %10 : vector<128x128xf32> to vector<128x128xbf16>
    %c0_9 = arith.constant 0 : index
    %c0_10 = arith.constant 0 : index
    %12 = vector.load %arg5[%c0_9, %c0_10] : memref<128x128xbf16, #tpu.memory_space<vmem>>, vector<128x128xbf16>
    %cst_11 = arith.constant dense<0.000000e+00> : vector<128x128xf32>
    %13 = tpu.matmul %11, %12, %cst_11 {dimension_numbers = #tpu.dot_dimension_numbers<[1], [0], [0], [1], [0, 0, 1, 1], [], []>} : vector<128x128xbf16>, vector<128x128xbf16>, vector<128x128xf32> -> vector<128x128xf32>
    %14 = arith.truncf %13 : vector<128x128xf32> to vector<128x128xbf16>
    %cst_12 = arith.constant dense<0.000000e+00> : vector<128x128xf32>
    %15 = tpu.matmul %0, %14, %cst_12 {dimension_numbers = #tpu.dot_dimension_numbers<[1], [0], [0], [1], [0, 0, 1, 1], [], []>} : vector<128x128xbf16>, vector<128x128xbf16>, vector<128x128xf32> -> vector<128x128xf32>
    %c0_13 = arith.constant 0 : index
    %c0_14 = arith.constant 0 : index
    %16 = vector.load %arg6[%c0_13, %c0_14] : memref<1x128xf32, #tpu.memory_space<vmem>>, vector<1x128xf32>
    %17 = vector.broadcast %16 : vector<1x128xf32> to vector<128x128xf32>
    %18 = arith.addf %15, %17 : vector<128x128xf32>
    %19 = tpu.iota {dimensions = array<i32: 1>} : vector<128x128xi32>
    %c8_i32 = arith.constant 8 : i32
    %20 = vector.broadcast %c8_i32 : i32 to vector<128x128xi32>
    %21 = arith.cmpi slt, %19, %20 : vector<128x128xi32>
    %cst_15 = arith.constant 0xFF800000 : f32
    %22 = vector.broadcast %cst_15 : f32 to vector<128x128xf32>
    %23 = arith.select %21, %18, %22 : vector<128x128xi1>, vector<128x128xf32>
    %cst_16 = arith.constant dense<0xFF800000> : vector<128xf32>
    %24 = vector.multi_reduction <maximumf>, %23, %cst_16 [1] : vector<128x128xf32> to vector<128xf32>
    %25 = vector.shape_cast %24 : vector<128xf32> to vector<128x1xf32>
    %26 = vector.broadcast %25 : vector<128x1xf32> to vector<128x128xf32>
    %27 = arith.subf %23, %26 : vector<128x128xf32>
    %28 = math.exp %27 : vector<128x128xf32>
    %cst_17 = arith.constant dense<0.000000e+00> : vector<128xf32>
    %29 = vector.multi_reduction <add>, %28, %cst_17 [1] : vector<128x128xf32> to vector<128xf32>
    %30 = vector.shape_cast %29 : vector<128xf32> to vector<128x1xf32>
    %31 = math.log %30 : vector<128x1xf32>
    %32 = vector.broadcast %25 : vector<128x1xf32> to vector<128x128xf32>
    %33 = arith.subf %18, %32 : vector<128x128xf32>
    %34 = vector.broadcast %31 : vector<128x1xf32> to vector<128x128xf32>
    %35 = arith.subf %33, %34 : vector<128x128xf32>
    %c0_18 = arith.constant 0 : index
    %c0_19 = arith.constant 0 : index
    %36 = vector.load %arg7[%c0_18, %c0_19] : memref<128x128xf32, #tpu.memory_space<vmem>>, vector<128x128xf32>
    tpu.vector_store %arg7[%c0_18, %c0_19], %35 {strides = array<i32>} : memref<128x128xf32, #tpu.memory_space<vmem>>, vector<128x128xf32>,
    return
  }
  func.func @transform_0(%arg0: i32) -> (i32, i32) {
    %c0_i32 = arith.constant 0 : i32
    %c0_i32_0 = arith.constant 0 : i32
    %c0_i32_1 = arith.constant 0 : i32
    return %c0_i32, %c0_i32_0 : i32, i32
  }
  func.func @transform_1(%arg0: i32) -> (i32, i32) {
    %c0_i32 = arith.constant 0 : i32
    %c0_i32_0 = arith.constant 0 : i32
    %c0_i32_1 = arith.constant 0 : i32
    return %c0_i32, %c0_i32_0 : i32, i32
  }
  func.func @transform_2(%arg0: i32) -> (i32, i32) {
    %c0_i32 = arith.constant 0 : i32
    %c0_i32_0 = arith.constant 0 : i32
    %c0_i32_1 = arith.constant 0 : i32
    return %c0_i32, %c0_i32_0 : i32, i32
  }
  func.func @transform_3(%arg0: i32) -> (i32, i32) {
    %c0_i32 = arith.constant 0 : i32
    %c0_i32_0 = arith.constant 0 : i32
    %c0_i32_1 = arith.constant 0 : i32
    return %c0_i32, %c0_i32_0 : i32, i32
  }
  func.func @transform_4(%arg0: i32) -> (i32, i32) {
    %c0_i32 = arith.constant 0 : i32
    %c0_i32_0 = arith.constant 0 : i32
    %c0_i32_1 = arith.constant 0 : i32
    return %c0_i32, %c0_i32_0 : i32, i32
  }
  func.func @transform_5(%arg0: i32) -> (i32, i32) {
    %c0_i32 = arith.constant 0 : i32
    %c0_i32_0 = arith.constant 0 : i32
    %c0_i32_1 = arith.constant 0 : i32
    return %c0_i32, %c0_i32_0 : i32, i32
  }
  func.func @transform_6(%arg0: i32) -> (i32, i32) {
    %c0_i32 = arith.constant 0 : i32
    %c0_i32_0 = arith.constant 0 : i32
    %c0_i32_1 = arith.constant 0 : i32
    return %c0_i32, %c0_i32_0 : i32, i32
  }
}

</mosaic_0001>

<bundles_post_ra>
// kernel: tpu_custom_call.1
= control target key start
LH: loop header
LB: loop body
LE: loop exit
PB: predicated region body
PF: predicated region fallthrough
CT: control target
= control target key end

     0   :  { %11 = vsyncpa [#allocation3], 0  ;;  %s1763_s0 = inlined_call_operand.hbm [shape: bf16[128,128], index: 0, kind: input, shape index: {}]   ;;  %s1764_s1 = inlined_call_operand.hbm [shape: bf16[128,128], index: 1, kind: input, shape index: {}]   ;;  %s1765_s2 = inlined_call_operand.hbm [shape: bf16[128,128], index: 2, kind: input, shape index: {}]   ;;  %s1766_s3 = inlined_call_operand.vmem [shape: f32[1,128], index: 3, kind: input, shape index: {}]   ;;  %s1767_s4 = inlined_call_operand.hbm [shape: bf16[128,128], index: 4, kind: input, shape index: {}]   ;;  %s1768_s5 = inlined_call_operand.vmem [shape: f32[1,128], index: 5, kind: input, shape index: {}]   ;;  %s1769_s6 = inlined_call_operand.hbm [shape: f32[128,128], index: 6, kind: output, shape index: {}]  }
   0x1   :  { %12 = vsyncpa [#allocation6], 0 }
   0x2   :  { %13 = vsyncpa [#allocation9], 0 }
   0x3   :  { %14 = vsyncpa [#allocation4], 0  ;;  %s1447_s21 = smov [#allocation5]   ;;  %s1448_s23 = smov [#allocation2]  }
   0x4   :  { %s32_s22 = sshll.u32 %s1447_s21, 4  ;;  %s20_s24 = sshll.u32 %s1448_s23, 4  ;;  %s33_s22 = int_to_ptr.vmem [resolvable:$true] %s32_s22  ;;  %s21_s24 = int_to_ptr.vmem [resolvable:$true] %s20_s24 }
   0x5   :  { %s1347_s25 = scalar_lea.vmem %s33_s22, 1024  ;;  %p1352_p1 = scmp.lt.s32.totalorder %s33_s22, %s33_s22 }
   0x6   :  { %p1348_p0 = scmp.ne.s32.totalorder %s33_s22, %s1347_s25  ;;  %p1353_p2 = scmp.lt.s32.totalorder %s1347_s25, %s1347_s25 }
   0x8   :  { %p1354_p3 = por %p1353_p2, %p1352_p1 }
   0xa   :  { %p1355_p4 = pnand %p1354_p3, %p1348_p0 }
   0xc   :  { %1358 = shalt.err (!%p1355_p4)
}
   0xd   :  { %s1449_s26 = smov 64   ;;  %s1450_s27 = smov 4  }
   0xe   :  { %38 = dma.hbm_to_vmem [thread:$0]  %s1764_s1, 1024, %s33_s22, [#allocation6], %s1449_s26, %s1449_s26, %s1450_s27  }
   0xf   :  { %s1367_s30 = scalar_lea.vmem %s21_s24, 1024  ;;  %p1372_p6 = scmp.lt.s32.totalorder %s21_s24, %s21_s24 }
  0x10   :  { %p1368_p5 = scmp.ne.s32.totalorder %s21_s24, %s1367_s30  ;;  %p1373_p7 = scmp.lt.s32.totalorder %s1367_s30, %s1367_s30 }
  0x12   :  { %p1374_p8 = por %p1373_p7, %p1372_p6 }
  0x14   :  { %p1375_p9 = pnand %p1374_p8, %p1368_p5 }
  0x16   :  { %1378 = shalt.err (!%p1375_p9)
}
  0x17   :  { %26 = dma.hbm_to_vmem [thread:$0]  %s1763_s0, 1024, %s21_s24, [#allocation3], %s1449_s26, %s1449_s26, %s1450_s27  }
  0x18   :  { %s1451_s9 = smov [#allocation7]   ;;  %s1452_s11 = smov [#allocation8]  }
  0x19   :  { %s44_s10 = sshll.u32 %s1451_s9, 4  ;;  %s58_s12 = sshll.u32 %s1452_s11, 4  ;;  %s45_s10 = int_to_ptr.vmem [resolvable:$true] %s44_s10  ;;  %s59_s12 = int_to_ptr.vmem [resolvable:$true] %s58_s12 }
  0x1a   :  { %s1387_s1 = scalar_lea.vmem %s45_s10, 1024  ;;  %p1392_p11 = scmp.lt.s32.totalorder %s45_s10, %s45_s10 }
  0x1b   :  { %p1388_p10 = scmp.ne.s32.totalorder %s45_s10, %s1387_s1  ;;  %p1393_p12 = scmp.lt.s32.totalorder %s1387_s1, %s1387_s1 }
  0x1d   :  { %p1394_p13 = por %p1393_p12, %p1392_p11 }
  0x1f   :  { %p1395_p0 = pnand %p1394_p13, %p1388_p10 }
  0x21   :  { %1398 = shalt.err (!%p1395_p0)
}
  0x22   :  { %50 = dma.hbm_to_vmem [thread:$0]  %s1765_s2, 1024, %s45_s10, [#allocation6], %s1449_s26, %s1449_s26, %s1450_s27  }
  0x23   :  { %s1407_s0 = scalar_lea.vmem %s59_s12, 1024  ;;  %p1412_p2 = scmp.lt.s32.totalorder %s59_s12, %s59_s12 }
  0x24   :  { %p1408_p1 = scmp.ne.s32.totalorder %s59_s12, %s1407_s0  ;;  %p1413_p3 = scmp.lt.s32.totalorder %s1407_s0, %s1407_s0 }
  0x26   :  { %p1414_p4 = por %p1413_p3, %p1412_p2 }
  0x28   :  { %p1415_p5 = pnand %p1414_p4, %p1408_p1 }
  0x2a   :  { %1418 = shalt.err (!%p1415_p5)
}
  0x2b   :  { %64 = dma.hbm_to_vmem [thread:$0]  %s1767_s4, 1024, %s59_s12, [#allocation9], %s1449_s26, %s1449_s26, %s1450_s27  }
  0x2c   :  { %1439 = dma.done.wait [#allocation3], 1024  }
  0x2d   :  { %1440 = vsyncadd [#allocation3], 4294966272 }
  0x2e   :  { %1441 = dma.done.wait [#allocation6], 2048  }
  0x2f   :  { %1442 = vsyncadd [#allocation6], 4294965248 }
  0x30   :  { %1443 = dma.done.wait [#allocation9], 1024  }
  0x31   :  { %1444 = vsyncadd [#allocation9], 4294966272  ;;  %v1243_v0 = vld [vmem:[#allocation7 + $0x38] sm:$0xff]   ;;  %v1244_v1 = vld [vmem:[#allocation7 + $0x30] sm:$0xff]  }
  0x32   :  { %1106 = vmatprep.subr.bf16.mxu0 %v1243_v0  ;;  %v1245_v2 = vld [vmem:[#allocation7 + $0x28] sm:$0xff]   ;;  %v1246_v3 = vld [vmem:[#allocation7 + $0x20] sm:$0xff]   ;;  %v1247_v5 = vld [vmem:[#allocation7 + $0x18] sm:$0xff]  }
  0x33   :  { %1107 = vmatpush3.bf16.msra.mxu0 %v1243_v0  ;;  %v1251_v4 = vld [vmem:[#allocation2] sm:$0xff]   ;;  %v1248_v6 = vld [vmem:[#allocation7 + $0x10] sm:$0xff]   ;;  %v1249_v7 = vld [vmem:[#allocation7 + $0x8] sm:$0xff]  }
  0x34   :  { %1108 = vmatprep.subr.bf16.mxu0 %v1244_v1  ;;  %1122 = vmatprep.mubr.bf16.mxu0 %v1251_v4  ;;  %v1250_v8 = vld [vmem:[#allocation7] sm:$0xff]   ;;  %v1252_v9 = vld [vmem:[#allocation2 + $0x8] sm:$0xff]   ;;  %v1253_v10 = vld [vmem:[#allocation2 + $0x10] sm:$0xff]  }
  0x35   :  { %v1254_v11 = vld [vmem:[#allocation2 + $0x18] sm:$0xff]   ;;  %v1255_v12 = vld [vmem:[#allocation2 + $0x20] sm:$0xff]   ;;  %v1256_v13 = vld [vmem:[#allocation2 + $0x28] sm:$0xff]  }
  0x36   :  { %v1257_v14 = vld [vmem:[#allocation2 + $0x30] sm:$0xff]   ;;  %v1258_v15 = vld [vmem:[#allocation2 + $0x38] sm:$0xff]   ;;  %v1515_v16 = vld [vmem:[#allocation5] sm:$0xff]  }
  0x37   :  { %1109 = vmatpush3.bf16.msra.mxu0 %v1244_v1  ;;  %1154 = vmatprep.mubr.bf16.mxu1 %v1515_v16  ;;  %v1267_v17 = vld [vmem:[#allocation8 + $0x38] sm:$0xff]   ;;  %v1268_v18 = vld [vmem:[#allocation8 + $0x30] sm:$0xff]   ;;  %v1269_v19 = vld [vmem:[#allocation8 + $0x28] sm:$0xff]  }
  0x38   :  { %1110 = vmatprep.subr.bf16.mxu0 %v1245_v2  ;;  %v1270_v20 = vld [vmem:[#allocation8 + $0x20] sm:$0xff]   ;;  %v1271_v21 = vld [vmem:[#allocation8 + $0x18] sm:$0xff]   ;;  %v1518_v46 = vld [vmem:[#allocation5 + $0x8] sm:$0xff]  }
  0x39   :  { %v1520_v47 = vld [vmem:[#allocation5 + $0x10] sm:$0xff]   ;;  %v1524_v48 = vld [vmem:[#allocation5 + $0x18] sm:$0xff]   ;;  %v1526_v49 = vld [vmem:[#allocation5 + $0x20] sm:$0xff]  }
  0x3a   :  { %v1530_v50 = vld [vmem:[#allocation5 + $0x28] sm:$0xff]   ;;  %v1532_v51 = vld [vmem:[#allocation5 + $0x30] sm:$0xff]   ;;  %v1536_v52 = vld [vmem:[#allocation5 + $0x38] sm:$0xff]  }
  0x3b   :  { %1111 = vmatpush3.bf16.msra.mxu0 %v1245_v2  ;;  %v1272_v53 = vld [vmem:[#allocation8 + $0x10] sm:$0xff]   ;;  %v1273_v54 = vld [vmem:[#allocation8 + $0x8] sm:$0xff]   ;;  %v1274_v55 = vld [vmem:[#allocation8] sm:$0xff]  }
  0x3c   :  { %1112 = vmatprep.subr.bf16.mxu0 %v1246_v3  ;;  %v1024_v58 = vld [vmem:[%s1766_s3] ss:$0 sm:$0xff] }
  0x3f   :  { %1113 = vmatpush3.bf16.msra.mxu0 %v1246_v3 }
  0x40   :  { %1114 = vmatprep.subr.bf16.mxu0 %v1247_v5 }
  0x43   :  { %1115 = vmatpush3.bf16.msra.mxu0 %v1247_v5 }
  0x44   :  { %1116 = vmatprep.subr.bf16.mxu0 %v1248_v6 }
  0x47   :  { %1117 = vmatpush3.bf16.msra.mxu0 %v1248_v6 }
  0x48   :  { %1118 = vmatprep.subr.bf16.mxu0 %v1249_v7 }
  0x4b   :  { %1119 = vmatpush3.bf16.msra.mxu0 %v1249_v7 }
  0x4c   :  { %1120 = vmatprep.subr.bf16.mxu0 %v1250_v8 }
  0x4f   :  { %1121 = vmatpush3.bf16.msra.mxu0 %v1250_v8 }
  0x50   :  { %1170 = vmatprep.subr.bf16.mxu0 %v1267_v17 }
  0x52   :  { %1123 = vmatmul.mubr.bf16.vlgmr.msra.gmra.mxu0 %v1252_v9 }
  0x53   :  { %1126 = vmatprep.mubr.bf16.mxu0 %v1253_v10  ;;  %1171 = vmatpush3.bf16.msra.mxu0 %v1267_v17 }
  0x54   :  { %1172 = vmatprep.subr.bf16.mxu0 %v1268_v18 }
  0x57   :  { %1173 = vmatpush3.bf16.msra.mxu0 %v1268_v18 }
  0x58   :  { %1174 = vmatprep.subr.bf16.mxu0 %v1269_v19 }
  0x5a   :  { %1127 = vmatmul.mubr.bf16.gmra.mxu0 %v1254_v11 }
  0x5b   :  { %1130 = vmatprep.mubr.bf16.mxu0 %v1255_v12  ;;  %1175 = vmatpush3.bf16.msra.mxu0 %v1269_v19 }
  0x5c   :  { %1176 = vmatprep.subr.bf16.mxu0 %v1270_v20 }
  0x5f   :  { %1177 = vmatpush3.bf16.msra.mxu0 %v1270_v20 }
  0x60   :  { %1178 = vmatprep.subr.bf16.mxu0 %v1271_v21 }
  0x62   :  { %1131 = vmatmul.mubr.bf16.gmra.mxu0 %v1256_v13 }
  0x63   :  { %1134 = vmatprep.mubr.bf16.mxu0 %v1257_v14  ;;  %1179 = vmatpush3.bf16.msra.mxu0 %v1271_v21 }
  0x64   :  { %1180 = vmatprep.subr.bf16.mxu0 %v1272_v53 }
  0x67   :  { %1181 = vmatpush3.bf16.msra.mxu0 %v1272_v53 }
  0x68   :  { %1182 = vmatprep.subr.bf16.mxu0 %v1273_v54 }
  0x6a   :  { %1135 = vmatmul.mubr.bf16.gmra.mxu0 %v1258_v15 }
  0x6b   :  { %1183 = vmatpush3.bf16.msra.mxu0 %v1273_v54 }
  0x6c   :  { %1184 = vmatprep.subr.bf16.mxu0 %v1274_v55 }
  0x6f   :  { %1185 = vmatpush3.bf16.msra.mxu0 %v1274_v55 }
 0x112   :  { %v1124_v22 = vpop.f32.mrf.mxu0 }
 0x114   :  { %v258_v23 = vpop.f32.mrf.mxu0 }
 0x116   :  { %v1125_v24 = vpop.f32.mrf.mxu0 }
 0x117   :  { %v322_v44 = vpack.c.bf16 %v1125_v24, %v1124_v22 }
 0x118   :  { %v261_v25 = vpop.f32.mrf.mxu0 }
 0x119   :  { %v321_v45 = vpack.c.bf16 %v261_v25, %v258_v23 }
 0x11a   :  { %v1128_v26 = vpop.f32.mrf.mxu0 }
 0x11c   :  { %v274_v27 = vpop.f32.mrf.mxu0 }
 0x11e   :  { %v1129_v28 = vpop.f32.mrf.mxu0 }
 0x11f   :  { %v324_v42 = vpack.c.bf16 %v1129_v28, %v1128_v26 }
 0x120   :  { %v277_v29 = vpop.f32.mrf.mxu0 }
 0x121   :  { %v323_v43 = vpack.c.bf16 %v277_v29, %v274_v27 }
 0x122   :  { %v1132_v30 = vpop.f32.mrf.mxu0 }
 0x124   :  { %v290_v31 = vpop.f32.mrf.mxu0 }
 0x126   :  { %v1133_v32 = vpop.f32.mrf.mxu0 }
 0x127   :  { %v326_v40 = vpack.c.bf16 %v1133_v32, %v1132_v30 }
 0x128   :  { %v293_v33 = vpop.f32.mrf.mxu0 }
 0x129   :  { %v325_v41 = vpack.c.bf16 %v293_v33, %v290_v31 }
 0x12a   :  { %v1136_v34 = vpop.f32.mrf.mxu0 }
 0x12c   :  { %v306_v35 = vpop.f32.mrf.mxu0 }
 0x12e   :  { %v1137_v36 = vpop.f32.mrf.mxu0 }
 0x12f   :  { %v328_v37 = vpack.c.bf16 %v1137_v36, %v1136_v34 }
 0x130   :  { %v309_v38 = vpop.f32.mrf.mxu0 }
 0x131   :  { %v327_v39 = vpack.c.bf16 %v309_v38, %v306_v35  ;;  %1138 = vmatprep.subr.bf16.mxu1 %v328_v37 }
 0x132   :  { %1139 = vmatpush3.bf16.msra.mxu1 %v328_v37 }
 0x133   :  { %1140 = vmatprep.subr.bf16.mxu1 %v327_v39 }
 0x136   :  { %1141 = vmatpush3.bf16.msra.mxu1 %v327_v39 }
 0x137   :  { %1142 = vmatprep.subr.bf16.mxu1 %v326_v40 }
 0x13a   :  { %1143 = vmatpush3.bf16.msra.mxu1 %v326_v40 }
 0x13b   :  { %1144 = vmatprep.subr.bf16.mxu1 %v325_v41 }
 0x13e   :  { %1145 = vmatpush3.bf16.msra.mxu1 %v325_v41 }
 0x13f   :  { %1146 = vmatprep.subr.bf16.mxu1 %v324_v42 }
 0x142   :  { %1147 = vmatpush3.bf16.msra.mxu1 %v324_v42 }
 0x143   :  { %1148 = vmatprep.subr.bf16.mxu1 %v323_v43 }
 0x146   :  { %1149 = vmatpush3.bf16.msra.mxu1 %v323_v43 }
 0x147   :  { %1150 = vmatprep.subr.bf16.mxu1 %v322_v44 }
 0x14a   :  { %1151 = vmatpush3.bf16.msra.mxu1 %v322_v44 }
 0x14b   :  { %1152 = vmatprep.subr.bf16.mxu1 %v321_v45 }
 0x14e   :  { %1153 = vmatpush3.bf16.msra.mxu1 %v321_v45 }
 0x151   :  { %1155 = vmatmul.mubr.bf16.vlgmr.msra.gmra.mxu1 %v1518_v46 }
 0x152   :  { %1158 = vmatprep.mubr.bf16.mxu1 %v1520_v47 }
 0x159   :  { %1159 = vmatmul.mubr.bf16.gmra.mxu1 %v1524_v48 }
 0x15a   :  { %1162 = vmatprep.mubr.bf16.mxu1 %v1526_v49 }
 0x161   :  { %1163 = vmatmul.mubr.bf16.gmra.mxu1 %v1530_v50 }
 0x162   :  { %1166 = vmatprep.mubr.bf16.mxu1 %v1532_v51 }
 0x169   :  { %1167 = vmatmul.mubr.bf16.gmra.mxu1 %v1536_v52 }
 0x16a   :  { %1218 = vmatprep.mubr.bf16.mxu1 %v1515_v16 }
 0x211   :  { %v1156_v56 = vpop.f32.mrf.mxu1 }
 0x212   :  { %v427_v62 = vadd.f32 %v1156_v56, %v1024_v58 }
 0x213   :  { %v418_v57 = vpop.f32.mrf.mxu1 }
 0x214   :  { %v419_v60 = vadd.f32 %v1024_v58, %v418_v57  ;;  %v483_v5 = vmax.f32 %v427_v62, 0.0 }
 0x215   :  { %v1157_v59 = vpop.f32.mrf.mxu1 }
 0x216   :  { %v430_v61 = vadd.f32 %v1157_v59, %v1024_v58  ;;  %v481_v3 = vmax.f32 %v419_v60, 0.0 }
 0x217   :  { %v421_v63 = vpop.f32.mrf.mxu1 }
 0x218   :  { %v422_v0 = vadd.f32 %v1024_v58, %v421_v63  ;;  %v484_v1 = vmax.f32 %v430_v61, 0.0 }
 0x219   :  { %v1160_v2 = vpop.f32.mrf.mxu1 }
 0x21a   :  { %v482_v4 = vmax.f32 %v422_v0, 0.0  ;;  %v498_v8 = vpack.c.bf16 %v484_v1, %v483_v5  ;;  %v443_v12 = vadd.f32 %v1160_v2, %v1024_v58 }
 0x21b   :  { %v434_v6 = vpop.f32.mrf.mxu1 }
 0x21c   :  { %v497_v7 = vpack.c.bf16 %v482_v4, %v481_v3  ;;  %v435_v10 = vadd.f32 %v1024_v58, %v434_v6  ;;  %v487_v19 = vmax.f32 %v443_v12, 0.0 }
 0x21d   :  { %v1161_v9 = vpop.f32.mrf.mxu1 }
 0x21e   :  { %v446_v11 = vadd.f32 %v1161_v9, %v1024_v58  ;;  %1186 = vmatprep.mubr.bf16.mxu0 %v497_v7  ;;  %v485_v17 = vmax.f32 %v435_v10, 0.0 }
 0x21f   :  { %v437_v13 = vpop.f32.mrf.mxu1  ;;  %1187 = vmatmul.mubr.bf16.vlgmr.msra.gmra.mxu0 %v498_v8 }
 0x220   :  { %v438_v14 = vadd.f32 %v1024_v58, %v437_v13  ;;  %v488_v15 = vmax.f32 %v446_v11, 0.0 }
 0x221   :  { %v1164_v16 = vpop.f32.mrf.mxu1 }
 0x222   :  { %v486_v18 = vmax.f32 %v438_v14, 0.0  ;;  %v500_v22 = vpack.c.bf16 %v488_v15, %v487_v19  ;;  %v459_v26 = vadd.f32 %v1164_v16, %v1024_v58  ;;  %v778_v16 = vlaneseq }
 0x223   :  { %v450_v20 = vpop.f32.mrf.mxu1 }
 0x224   :  { %v499_v21 = vpack.c.bf16 %v486_v18, %v485_v17  ;;  %v451_v24 = vadd.f32 %v1024_v58, %v450_v20  ;;  %v491_v33 = vmax.f32 %v459_v26, 0.0  ;;  %v1550_v17 = vand.u32 127, %v778_v16  ;;  %v1041_v18 = vld [vmem:[%s1768_s5] ss:$0 sm:$0xff]  ;;  %s1453_s5 = smov [#allocation10]  }
 0x225   :  { %v1165_v23 = vpop.f32.mrf.mxu1  ;;  %s994_s18 = sshll.u32 %s1453_s5, 4  ;;  %s995_s18 = int_to_ptr.vmem [resolvable:$true] %s994_s18 }
 0x226   :  { %v462_v25 = vadd.f32 %v1165_v23, %v1024_v58  ;;  %1190 = vmatprep.mubr.bf16.mxu0 %v499_v21  ;;  %v489_v31 = vmax.f32 %v451_v24, 0.0  ;;  %vm780_vm0 = vcmp.lt.s32.totalorder %v1550_v17, 8  ;;  %s1419_s19 = scalar_lea.vmem %s995_s18, 2048  ;;  %p1424_p7 = scmp.lt.s32.totalorder %s995_s18, %s995_s18 }
 0x227   :  { %v453_v27 = vpop.f32.mrf.mxu1  ;;  %1191 = vmatmul.mubr.bf16.gmra.mxu0 %v500_v22  ;;  %p1420_p6 = scmp.ne.s32.totalorder %s995_s18, %s1419_s19  ;;  %p1425_p8 = scmp.lt.s32.totalorder %s1419_s19, %s1419_s19 }
 0x228   :  { %v454_v28 = vadd.f32 %v1024_v58, %v453_v27  ;;  %v492_v29 = vmax.f32 %v462_v25, 0.0 }
 0x229   :  { %v1168_v30 = vpop.f32.mrf.mxu1  ;;  %p1426_p9 = por %p1425_p8, %p1424_p7 }
 0x22a   :  { %v490_v32 = vmax.f32 %v454_v28, 0.0  ;;  %v502_v36 = vpack.c.bf16 %v492_v29, %v491_v33  ;;  %v475_v40 = vadd.f32 %v1168_v30, %v1024_v58 }
 0x22b   :  { %v466_v34 = vpop.f32.mrf.mxu1  ;;  %p1427_p10 = pnand %p1426_p9, %p1420_p6 }
 0x22c   :  { %v501_v35 = vpack.c.bf16 %v490_v32, %v489_v31  ;;  %v467_v38 = vadd.f32 %v1024_v58, %v466_v34  ;;  %v495_v53 = vmax.f32 %v475_v40, 0.0 }
 0x22d   :  { %v1169_v37 = vpop.f32.mrf.mxu1 }
 0x22e   :  { %v478_v39 = vadd.f32 %v1169_v37, %v1024_v58  ;;  %1194 = vmatprep.mubr.bf16.mxu0 %v501_v35  ;;  %v493_v44 = vmax.f32 %v467_v38, 0.0 }
 0x22f   :  { %v469_v41 = vpop.f32.mrf.mxu1  ;;  %1195 = vmatmul.mubr.bf16.gmra.mxu0 %v502_v36 }
 0x230   :  { %v470_v42 = vadd.f32 %v1024_v58, %v469_v41  ;;  %v496_v43 = vmax.f32 %v478_v39, 0.0 }
 0x232   :  { %v494_v45 = vmax.f32 %v470_v42, 0.0  ;;  %v504_v55 = vpack.c.bf16 %v496_v43, %v495_v53 }
 0x234   :  { %v503_v54 = vpack.c.bf16 %v494_v45, %v493_v44 }
 0x236   :  { %1198 = vmatprep.mubr.bf16.mxu0 %v503_v54 }
 0x237   :  { %1199 = vmatmul.mubr.bf16.gmra.mxu0 %v504_v55 }
 0x2df   :  { %v1188_v56 = vpop.f32.mrf.mxu0 }
 0x2e1   :  { %v603_v57 = vpop.f32.mrf.mxu0 }
 0x2e3   :  { %v1189_v59 = vpop.f32.mrf.mxu0 }
 0x2e4   :  { %v667_v14 = vpack.c.bf16 %v1189_v59, %v1188_v56 }
 0x2e5   :  { %v606_v60 = vpop.f32.mrf.mxu0 }
 0x2e6   :  { %v666_v15 = vpack.c.bf16 %v606_v60, %v603_v57 }
 0x2e7   :  { %v1192_v61 = vpop.f32.mrf.mxu0 }
 0x2e9   :  { %v619_v62 = vpop.f32.mrf.mxu0 }
 0x2eb   :  { %v1193_v63 = vpop.f32.mrf.mxu0 }
 0x2ec   :  { %v669_v12 = vpack.c.bf16 %v1193_v63, %v1192_v61 }
 0x2ed   :  { %v622_v0 = vpop.f32.mrf.mxu0 }
 0x2ee   :  { %v668_v13 = vpack.c.bf16 %v622_v0, %v619_v62 }
 0x2ef   :  { %v1196_v1 = vpop.f32.mrf.mxu0 }
 0x2f1   :  { %v635_v2 = vpop.f32.mrf.mxu0 }
 0x2f3   :  { %v1197_v3 = vpop.f32.mrf.mxu0 }
 0x2f4   :  { %v671_v10 = vpack.c.bf16 %v1197_v3, %v1196_v1 }
 0x2f5   :  { %v638_v58 = vpop.f32.mrf.mxu0 }
 0x2f6   :  { %v670_v11 = vpack.c.bf16 %v638_v58, %v635_v2 }
 0x2f7   :  { %v1200_v4 = vpop.f32.mrf.mxu0 }
 0x2f9   :  { %v651_v5 = vpop.f32.mrf.mxu0 }
 0x2fb   :  { %v1201_v6 = vpop.f32.mrf.mxu0 }
 0x2fc   :  { %v673_v7 = vpack.c.bf16 %v1201_v6, %v1200_v4 }
 0x2fd   :  { %v654_v8 = vpop.f32.mrf.mxu0 }
 0x2fe   :  { %v672_v9 = vpack.c.bf16 %v654_v8, %v651_v5  ;;  %1202 = vmatprep.subr.bf16.mxu1 %v673_v7 }
 0x2ff   :  { %1203 = vmatpush3.bf16.msra.mxu1 %v673_v7 }
 0x300   :  { %1204 = vmatprep.subr.bf16.mxu1 %v672_v9 }
 0x303   :  { %1205 = vmatpush3.bf16.msra.mxu1 %v672_v9 }
 0x304   :  { %1206 = vmatprep.subr.bf16.mxu1 %v671_v10 }
 0x307   :  { %1207 = vmatpush3.bf16.msra.mxu1 %v671_v10 }
 0x308   :  { %1208 = vmatprep.subr.bf16.mxu1 %v670_v11 }
 0x30b   :  { %1209 = vmatpush3.bf16.msra.mxu1 %v670_v11 }
 0x30c   :  { %1210 = vmatprep.subr.bf16.mxu1 %v669_v12 }
 0x30f   :  { %1211 = vmatpush3.bf16.msra.mxu1 %v669_v12 }
 0x310   :  { %1212 = vmatprep.subr.bf16.mxu1 %v668_v13 }
 0x313   :  { %1213 = vmatpush3.bf16.msra.mxu1 %v668_v13 }
 0x314   :  { %1214 = vmatprep.subr.bf16.mxu1 %v667_v14 }
 0x317   :  { %1215 = vmatpush3.bf16.msra.mxu1 %v667_v14 }
 0x318   :  { %1216 = vmatprep.subr.bf16.mxu1 %v666_v15 }
 0x31b   :  { %1217 = vmatpush3.bf16.msra.mxu1 %v666_v15 }
 0x31e   :  { %1219 = vmatmul.mubr.bf16.vlgmr.msra.gmra.mxu1 %v1518_v46 }
 0x31f   :  { %1222 = vmatprep.mubr.bf16.mxu1 %v1520_v47 }
 0x326   :  { %1223 = vmatmul.mubr.bf16.gmra.mxu1 %v1524_v48 }
 0x327   :  { %1226 = vmatprep.mubr.bf16.mxu1 %v1526_v49 }
 0x32e   :  { %1227 = vmatmul.mubr.bf16.gmra.mxu1 %v1530_v50 }
 0x32f   :  { %1230 = vmatprep.mubr.bf16.mxu1 %v1532_v51 }
 0x336   :  { %1231 = vmatmul.mubr.bf16.gmra.mxu1 %v1536_v52 }
 0x3de   :  { %v1220_v46 = vpop.f32.mrf.mxu1 }
 0x3df   :  { %v1556_v47 = vadd.f32 %v1220_v46, %v1041_v18 }
 0x3e0   :  { %v715_v48 = vpop.f32.mrf.mxu1 }
 0x3e1   :  { %v1558_v49 = vadd.f32 %v1041_v18, %v715_v48  ;;  %v1563_v50 = vsel %vm780_vm0, %v1556_v47, -inf }
 0x3e2   :  { %801 = vmax.xlane.f32.xlu1 %v1563_v50  ;;  %v1221_v51 = vpop.f32.mrf.mxu1 }
 0x3e3   :  { %v1566_v52 = vadd.f32 %v1221_v51, %v1041_v18  ;;  %v1571_v19 = vsel %vm780_vm0, %v1558_v49, -inf }
 0x3e4   :  { %v718_v20 = vpop.f32.mrf.mxu1  ;;  %797 = vmax.xlane.f32.xlu0 %v1571_v19 }
 0x3e5   :  { %v1574_v21 = vadd.f32 %v1041_v18, %v718_v20  ;;  %v784_v22 = vsel %vm780_vm0, %v1566_v52, -inf }
 0x3e6   :  { %803 = vmax.xlane.f32.xlu1 %v784_v22  ;;  %v1224_v23 = vpop.f32.mrf.mxu1 }
 0x3e7   :  { %v1579_v24 = vadd.f32 %v1224_v23, %v1041_v18  ;;  %v782_v25 = vsel %vm780_vm0, %v1574_v21, -inf }
 0x3e8   :  { %v731_v26 = vpop.f32.mrf.mxu1  ;;  %799 = vmax.xlane.f32.xlu0 %v782_v25 }
 0x3e9   :  { %v1584_v28 = vadd.f32 %v1041_v18, %v731_v26  ;;  %v787_v30 = vsel %vm780_vm0, %v1579_v24, -inf }
 0x3ea   :  { %v1225_v27 = vpop.f32.mrf.mxu1 }
 0x3eb   :  { %v1586_v29 = vadd.f32 %v1225_v27, %v1041_v18  ;;  %v785_v36 = vsel %vm780_vm0, %v1584_v28, -inf }
 0x3ec   :  { %v734_v31 = vpop.f32.mrf.mxu1  ;;  %809 = vmax.xlane.f32.xlu0 %v787_v30 }
 0x3ed   :  { %v1591_v32 = vadd.f32 %v1041_v18, %v734_v31  ;;  %v788_v33 = vsel %vm780_vm0, %v1586_v29, -inf }
 0x3ee   :  { %811 = vmax.xlane.f32.xlu1 %v788_v33  ;;  %v1228_v34 = vpop.f32.mrf.mxu1 }
 0x3ef   :  { %v1596_v35 = vadd.f32 %v1228_v34, %v1041_v18  ;;  %v1604_v38 = vsel %vm780_vm0, %v1591_v32, -inf }
 0x3f0   :  { %v747_v37 = vpop.f32.mrf.mxu1  ;;  %805 = vmax.xlane.f32.xlu0 %v785_v36 }
 0x3f1   :  { %v1607_v40 = vadd.f32 %v1041_v18, %v747_v37  ;;  %v1614_v42 = vsel %vm780_vm0, %v1596_v35, -inf }
 0x3f2   :  { %v1229_v39 = vpop.f32.mrf.mxu1  ;;  %807 = vmax.xlane.f32.xlu1 %v1604_v38 }
 0x3f3   :  { %v1609_v41 = vadd.f32 %v1229_v39, %v1041_v18  ;;  %v1628_v54 = vsel %vm780_vm0, %v1607_v40, -inf }
 0x3f4   :  { %v750_v43 = vpop.f32.mrf.mxu1  ;;  %817 = vmax.xlane.f32.xlu0 %v1614_v42 }
 0x3f5   :  { %v1617_v44 = vadd.f32 %v1041_v18, %v750_v43  ;;  %v1622_v45 = vsel %vm780_vm0, %v1609_v41, -inf }
 0x3f6   :  { %v1232_v53 = vpop.f32.mrf.mxu1  ;;  %819 = vmax.xlane.f32.xlu1 %v1622_v45 }
 0x3f7   :  { %v1636_v57 = vsel %vm780_vm0, %v1617_v44, -inf  ;;  %v1639_v60 = vadd.f32 %v1232_v53, %v1041_v18 }
 0x3f8   :  { %v763_v55 = vpop.f32.mrf.mxu1  ;;  %813 = vmax.xlane.f32.xlu0 %v1628_v54 }
 0x3f9   :  { %v1631_v56 = vadd.f32 %v1041_v18, %v763_v55  ;;  %v1659_v2 = vsel %vm780_vm0, %v1639_v60, -inf }
 0x3fa   :  { %v1233_v59 = vpop.f32.mrf.mxu1  ;;  %815 = vmax.xlane.f32.xlu1 %v1636_v57 }
 0x3fb   :  { %v1644_v61 = vsel %vm780_vm0, %v1631_v56, -inf  ;;  %v1649_v0 = vadd.f32 %v1233_v59, %v1041_v18 }
 0x3fc   :  { %v766_v62 = vpop.f32.mrf.mxu1  ;;  %821 = vmax.xlane.f32.xlu0 %v1644_v61 }
 0x3fd   :  { %v1647_v63 = vadd.f32 %v1041_v18, %v766_v62  ;;  %v1666_v3 = vsel %vm780_vm0, %v1649_v0, -inf }
 0x3ff   :  { %v1654_v1 = vsel %vm780_vm0, %v1647_v63, -inf }
 0x400   :  { %823 = vmax.xlane.f32.xlu1 %v1654_v1  ;;  %825 = vmax.xlane.f32.xlu0 %v1659_v2 }
 0x404   :  { %827 = vmax.xlane.f32.xlu1 %v1666_v3 }
 0x46b   :  { %v1669_v58 = vpop.xlane.xlu1 %801 }
 0x46c   :  { %v831_v4 = vsub.f32 %v1563_v50, %v1669_v58 }
 0x46d   :  { %v1673_v5 = vpop.xlane.xlu0 %797 }
 0x46e   :  { %v849_v6 = vmul.f32 1.442695, %v831_v4  ;;  %v829_v7 = vsub.f32 %v1571_v19, %v1673_v5 }
 0x46f   :  { %v1677_v8 = vpop.xlane.xlu1 %803 }
 0x470   :  { %1275 = vpow2.f32 %v849_v6  ;;  %v845_v9 = vmul.f32 1.442695, %v829_v7  ;;  %v832_v10 = vsub.f32 %v784_v22, %v1677_v8 }
 0x471   :  { %v1680_v11 = vpop.xlane.xlu0 %799 }
 0x472   :  { %v851_v12 = vmul.f32 1.442695, %v832_v10  ;;  %v830_v13 = vsub.f32 %v782_v25, %v1680_v11  ;;  %1277 = vpow2.f32 %v845_v9 }
 0x474   :  { %1279 = vpow2.f32 %v851_v12  ;;  %v847_v14 = vmul.f32 1.442695, %v830_v13 }
 0x475   :  { %v1683_v15 = vpop.xlane.xlu0 %809 }
 0x476   :  { %v835_v16 = vsub.f32 %v787_v30, %v1683_v15  ;;  %1281 = vpow2.f32 %v847_v14 }
 0x477   :  { %v1686_v17 = vpop.xlane.xlu1 %811 }
 0x478   :  { %v857_v18 = vmul.f32 1.442695, %v835_v16  ;;  %v836_v46 = vsub.f32 %v788_v33, %v1686_v17 }
 0x479   :  { %v1689_v48 = vpop.xlane.xlu0 %805 }
 0x47a   :  { %1283 = vpow2.f32 %v857_v18  ;;  %v859_v50 = vmul.f32 1.442695, %v836_v46  ;;  %v833_v51 = vsub.f32 %v785_v36, %v1689_v48 }
 0x47b   :  { %v1692_v19 = vpop.xlane.xlu1 %807 }
 0x47c   :  { %1285 = vpow2.f32 %v859_v50  ;;  %v853_v20 = vmul.f32 1.442695, %v833_v51  ;;  %v834_v22 = vsub.f32 %v1604_v38, %v1692_v19 }
 0x47d   :  { %v1276_v23 = vpop.eup %1275  ;;  %v1696_v25 = vpop.xlane.xlu0 %817 }
 0x47e   :  { %1287 = vpow2.f32 %v853_v20  ;;  %v855_v26 = vmul.f32 1.442695, %v834_v22  ;;  %v839_v27 = vsub.f32 %v1614_v42, %v1696_v25  ;;  %881 = vadd.xlane.f32.xlu0 %v1276_v23 }
 0x47f   :  { %v1700_v30 = vpop.xlane.xlu1 %819  ;;  %v1278_v31 = vpop.eup %1277 }
 0x480   :  { %1289 = vpow2.f32 %v855_v26  ;;  %v865_v33 = vmul.f32 1.442695, %v839_v27  ;;  %v840_v34 = vsub.f32 %v1622_v45, %v1700_v30 }
 0x481   :  { %v1280_v36 = vpop.eup %1279  ;;  %v1704_v37 = vpop.xlane.xlu0 %813 }
 0x482   :  { %1291 = vpow2.f32 %v865_v33  ;;  %v867_v38 = vmul.f32 1.442695, %v840_v34  ;;  %v837_v39 = vsub.f32 %v1628_v54, %v1704_v37  ;;  %883 = vadd.xlane.f32.xlu1 %v1280_v36  ;;  %877 = vadd.xlane.f32.xlu0 %v1278_v31 }
 0x483   :  { %v1708_v42 = vpop.xlane.xlu1 %815  ;;  %v1282_v55 = vpop.eup %1281 }
 0x484   :  { %1293 = vpow2.f32 %v867_v38  ;;  %v861_v43 = vmul.f32 1.442695, %v837_v39  ;;  %v838_v53 = vsub.f32 %v1636_v57, %v1708_v42 }
 0x485   :  { %v1712_v59 = vpop.xlane.xlu0 %821 }
 0x486   :  { %1295 = vpow2.f32 %v861_v43  ;;  %v863_v45 = vmul.f32 1.442695, %v838_v53  ;;  %v841_v62 = vsub.f32 %v1644_v61, %v1712_v59  ;;  %879 = vadd.xlane.f32.xlu1 %v1282_v55  ;;  %v943_v43 = vsub.f32 %v1556_v47, %v1669_v58 }
 0x487   :  { %v1284_v4 = vpop.eup %1283 }
 0x488   :  { %1297 = vpow2.f32 %v863_v45  ;;  %v869_v54 = vmul.f32 1.442695, %v841_v62  ;;  %889 = vadd.xlane.f32.xlu0 %v1284_v4 }
 0x489   :  { %v1286_v6 = vpop.eup %1285  ;;  %v1716_v7 = vpop.xlane.xlu1 %823 }
 0x48a   :  { %v1718_v9 = vpop.xlane.xlu0 %825  ;;  %1299 = vpow2.f32 %v869_v54  ;;  %v842_v57 = vsub.f32 %v1654_v1, %v1716_v7  ;;  %891 = vadd.xlane.f32.xlu1 %v1286_v6  ;;  %v944_v6 = vsub.f32 %v1566_v52, %v1677_v8 }
 0x48b   :  { %v843_v10 = vsub.f32 %v1659_v2, %v1718_v9  ;;  %v1288_v12 = vpop.eup %1287 }
 0x48c   :  { %v871_v61 = vmul.f32 1.442695, %v842_v57  ;;  %885 = vadd.xlane.f32.xlu0 %v1288_v12 }
 0x48d   :  { %v873_v13 = vmul.f32 1.442695, %v843_v10  ;;  %v1290_v14 = vpop.eup %1289  ;;  %v1724_v16 = vpop.xlane.xlu1 %827  ;;  %v941_v10 = vsub.f32 %v1558_v49, %v1673_v5 }
 0x48e   :  { %1301 = vpow2.f32 %v871_v61  ;;  %v844_v18 = vsub.f32 %v1666_v3, %v1724_v16  ;;  %887 = vadd.xlane.f32.xlu1 %v1290_v14 }
 0x48f   :  { %v1292_v46 = vpop.eup %1291  ;;  %1303 = vpow2.f32 %v873_v13 }
 0x490   :  { %v875_v50 = vmul.f32 1.442695, %v844_v18  ;;  %897 = vadd.xlane.f32.xlu0 %v1292_v46  ;;  %v942_v18 = vsub.f32 %v1574_v21, %v1680_v11 }
 0x491   :  { %v1294_v1 = vpop.eup %1293 }
 0x492   :  { %1305 = vpow2.f32 %v875_v50  ;;  %899 = vadd.xlane.f32.xlu1 %v1294_v1  ;;  %v947_v50 = vsub.f32 %v1579_v24, %v1683_v15 }
 0x493   :  { %v1296_v2 = vpop.eup %1295 }
 0x494   :  { %893 = vadd.xlane.f32.xlu0 %v1296_v2 }
 0x495   :  { %v1298_v51 = vpop.eup %1297 }
 0x496   :  { %895 = vadd.xlane.f32.xlu1 %v1298_v51  ;;  %v948_v51 = vsub.f32 %v1586_v29, %v1686_v17 }
 0x497   :  { %v1300_v20 = vpop.eup %1299 }
 0x498   :  { %901 = vadd.xlane.f32.xlu0 %v1300_v20 }
 0x49b   :  { %v1302_v22 = vpop.eup %1301 }
 0x49c   :  { %v1304_v23 = vpop.eup %1303  ;;  %903 = vadd.xlane.f32.xlu1 %v1302_v22  ;;  %v945_v22 = vsub.f32 %v1584_v28, %v1689_v48 }
 0x49d   :  { %905 = vadd.xlane.f32.xlu0 %v1304_v23 }
 0x49f   :  { %v1306_v26 = vpop.eup %1305 }
 0x4a0   :  { %907 = vadd.xlane.f32.xlu1 %v1306_v26 }
 0x507   :  { %v882_v3 = vpop.xlane.xlu0 %881 }
 0x508   :  { %1307 = vlog2.f32 %v882_v3  ;;  %v946_v3 = vsub.f32 %v1591_v32, %v1692_v19 }
 0x50b   :  { %v884_v27 = vpop.xlane.xlu1 %883  ;;  %v878_v31 = vpop.xlane.xlu0 %877 }
 0x50c   :  { %1309 = vlog2.f32 %v884_v27 }
 0x50d   :  { %1311 = vlog2.f32 %v878_v31 }
 0x50f   :  { %v880_v33 = vpop.xlane.xlu1 %879 }
 0x510   :  { %1313 = vlog2.f32 %v880_v33  ;;  %v951_v33 = vsub.f32 %v1596_v35, %v1696_v25  ;;  %v950_v25 = vsub.f32 %v1617_v44, %v1708_v42  ;;  %v955_v44 = vsub.f32 %v1639_v60, %v1718_v9 }
 0x511   :  { %v890_v34 = vpop.xlane.xlu0 %889 }
 0x512   :  { %1315 = vlog2.f32 %v890_v34 }
 0x513   :  { %v892_v36 = vpop.xlane.xlu1 %891 }
 0x514   :  { %1317 = vlog2.f32 %v892_v36 }
 0x515   :  { %v1308_v38 = vpop.eup %1307  ;;  %v886_v39 = vpop.xlane.xlu0 %885 }
 0x516   :  { %v914_v53 = vmul.f32 0.6931472, %v1308_v38  ;;  %1319 = vlog2.f32 %v886_v39  ;;  %v952_v38 = vsub.f32 %v1609_v41, %v1700_v30  ;;  %v953_v41 = vsub.f32 %v1631_v56, %v1712_v59 }
 0x517   :  { %v888_v55 = vpop.xlane.xlu1 %887  ;;  %v956_v56 = vsub.f32 %v1649_v0, %v1724_v16 }
 0x518   :  { %v959_v45 = vsub.f32 %v943_v43, %v914_v53  ;;  %1321 = vlog2.f32 %v888_v55  ;;  %v949_v43 = vsub.f32 %v1607_v40, %v1704_v37 }
 0x519   :  { %v1310_v62 = vpop.eup %1309  ;;  %v898_v4 = vpop.xlane.xlu0 %897 }
 0x51a   :  { %v1312_v54 = vpop.eup %1311  ;;  %975 = vst [vmem:[#allocation10 + $0x10] sm:$0xff] %v959_v45  ;;  %v916_v57 = vmul.f32 0.6931472, %v1310_v62  ;;  %1323 = vlog2.f32 %v898_v4 }
 0x51b   :  { %v910_v12 = vmul.f32 0.6931472, %v1312_v54  ;;  %v900_v61 = vpop.xlane.xlu1 %899 }
 0x51c   :  { %v960_v47 = vsub.f32 %v944_v6, %v916_v57  ;;  %1325 = vlog2.f32 %v900_v61  ;;  %v954_v57 = vsub.f32 %v1647_v63, %v1716_v7 }
 0x51d   :  { %v1314_v58 = vpop.eup %1313  ;;  %v957_v13 = vsub.f32 %v941_v10, %v910_v12  ;;  %v894_v14 = vpop.xlane.xlu0 %893 }
 0x51e   :  { %976 = vst [vmem:[#allocation10 + $0x18] sm:$0xff] %v960_v47  ;;  %v912_v46 = vmul.f32 0.6931472, %v1314_v58  ;;  %1327 = vlog2.f32 %v894_v14 }
 0x51f   :  { %v1316_v52 = vpop.eup %1315  ;;  %973 = vst [vmem:[#allocation10] sm:$0xff] %v957_v13  ;;  %v896_v8 = vpop.xlane.xlu1 %895 }
 0x520   :  { %v958_v49 = vsub.f32 %v942_v18, %v912_v46  ;;  %v922_v5 = vmul.f32 0.6931472, %v1316_v52  ;;  %1329 = vlog2.f32 %v896_v8 }
 0x521   :  { %v1318_v1 = vpop.eup %1317  ;;  %v902_v2 = vpop.xlane.xlu0 %901 }
 0x522   :  { %974 = vst [vmem:[#allocation10 + $0x8] sm:$0xff] %v958_v49  ;;  %v963_v20 = vsub.f32 %v947_v50, %v922_v5  ;;  %v924_v21 = vmul.f32 0.6931472, %v1318_v1  ;;  %1331 = vlog2.f32 %v902_v2 }
 0x523   :  { %v1320_v11 = vpop.eup %1319 }
 0x524   :  { %979 = vst [vmem:[#allocation10 + $0x30] sm:$0xff] %v963_v20  ;;  %v964_v23 = vsub.f32 %v948_v51, %v924_v21  ;;  %v918_v26 = vmul.f32 0.6931472, %v1320_v11 }
 0x525   :  { %v1322_v24 = vpop.eup %1321  ;;  %v904_v15 = vpop.xlane.xlu1 %903 }
 0x526   :  { %980 = vst [vmem:[#allocation10 + $0x38] sm:$0xff] %v964_v23  ;;  %v961_v27 = vsub.f32 %v945_v22, %v918_v26  ;;  %v920_v31 = vmul.f32 0.6931472, %v1322_v24  ;;  %1333 = vlog2.f32 %v904_v15  ;;  %v906_v29 = vpop.xlane.xlu0 %905 }
 0x527   :  { %v1324_v17 = vpop.eup %1323  ;;  %1335 = vlog2.f32 %v906_v29 }
 0x528   :  { %977 = vst [vmem:[#allocation10 + $0x20] sm:$0xff] %v961_v27  ;;  %v962_v28 = vsub.f32 %v946_v3, %v920_v31  ;;  %v930_v48 = vmul.f32 0.6931472, %v1324_v17 }
 0x529   :  { %v1326_v34 = vpop.eup %1325  ;;  %v908_v36 = vpop.xlane.xlu1 %907 }
 0x52a   :  { %978 = vst [vmem:[#allocation10 + $0x28] sm:$0xff] %v962_v28  ;;  %v967_v32 = vsub.f32 %v951_v33, %v930_v48  ;;  %v932_v19 = vmul.f32 0.6931472, %v1326_v34  ;;  %1337 = vlog2.f32 %v908_v36 }
 0x52b   :  { %v1328_v39 = vpop.eup %1327 }
 0x52c   :  { %983 = vst [vmem:[#allocation10 + $0x50] sm:$0xff] %v967_v32  ;;  %v968_v53 = vsub.f32 %v952_v38, %v932_v19  ;;  %v926_v55 = vmul.f32 0.6931472, %v1328_v39 }
 0x52d   :  { %v1330_v35 = vpop.eup %1329 }
 0x52e   :  { %984 = vst [vmem:[#allocation10 + $0x58] sm:$0xff] %v968_v53  ;;  %v965_v45 = vsub.f32 %v949_v43, %v926_v55  ;;  %v928_v62 = vmul.f32 0.6931472, %v1330_v35 }
 0x52f   :  { %v1332_v4 = vpop.eup %1331 }
 0x530   :  { %981 = vst [vmem:[#allocation10 + $0x40] sm:$0xff] %v965_v45  ;;  %v966_v30 = vsub.f32 %v950_v25, %v928_v62  ;;  %v934_v54 = vmul.f32 0.6931472, %v1332_v4 }
 0x532   :  { %982 = vst [vmem:[#allocation10 + $0x48] sm:$0xff] %v966_v30  ;;  %v969_v6 = vsub.f32 %v953_v41, %v934_v54 }
 0x533   :  { %v1334_v40 = vpop.eup %1333 }
 0x534   :  { %v1336_v37 = vpop.eup %1335  ;;  %985 = vst [vmem:[#allocation10 + $0x60] sm:$0xff] %v969_v6  ;;  %v936_v10 = vmul.f32 0.6931472, %v1334_v40 }
 0x535   :  { %v938_v42 = vmul.f32 0.6931472, %v1336_v37 }
 0x536   :  { %v970_v12 = vsub.f32 %v954_v57, %v936_v10 }
 0x537   :  { %v1338_v61 = vpop.eup %1337  ;;  %v971_v47 = vsub.f32 %v955_v44, %v938_v42 }
 0x538   :  { %986 = vst [vmem:[#allocation10 + $0x68] sm:$0xff] %v970_v12  ;;  %v940_v59 = vmul.f32 0.6931472, %v1338_v61 }
 0x539   :  { %987 = vst [vmem:[#allocation10 + $0x70] sm:$0xff] %v971_v47 }
 0x53a   :  { %v972_v58 = vsub.f32 %v956_v56, %v940_v59 }
 0x53c   :  { %988 = vst [vmem:[#allocation10 + $0x78] sm:$0xff] %v972_v58 }
 0x53d   :  { %1430 = shalt.err (!%p1427_p10)
}
 0x53e   :  { %s1454_s20 = smov 128   ;;  %s1455_s21 = smov 8  }
 0x53f   :  { %1000 = dma.vmem_to_hbm [thread:$0]  %s995_s18, 2048, %s1769_s6, [#allocation4], %s1454_s20, %s1454_s20, %s1455_s21  }
 0x540   :  { %1445 = dma.done.wait [#allocation4], 2048  }
 0x541   :  { %1446 = vsyncadd [#allocation4], 4294965248 }
 0x542   :  { %1004 = vsyncpa [#allocation3], 1 }
 0x543   :  { %1005 = vsyncpa [#allocation6], 1 }
 0x544   :  { %1006 = vsyncpa [#allocation9], 1 }
 0x545   :  { %1007 = vsyncpa [#allocation4], 1 }

</bundles_post_ra>
